<compile_context>
chip_gen: v6e
topology: v6e:2x2x1
jax: 0.10.0
libtpu: 0.0.40
codegen_flags: <defaults>
</compile_context>

<pallas_src>
import jax
import jax.numpy as jnp
from jax import lax
from jax.experimental import pallas as pl
from jax.experimental.pallas import tpu as pltpu

EXCHANGE_P = 2   # ChannelExchange period
MASK_P = 4       # PerturbMask period (p=4 in DIM.__init__)


# --------------------------------------------------------------------------------------
# Kernels
# --------------------------------------------------------------------------------------
def _fused_kernel(x1_ref, x2_ref, w1_ref, w2_ref, out_ref):
    # x1/x2/out: (Bn, C, HW) f32   w1: (HID, C) bf16 (keep*sgn folded)   w2: (C, HID) f32
    d = x1_ref[...] - x2_ref[...]                                  # (Bn, C, HW)
    bn, c, _ = d.shape
    hid = w1_ref.shape[0]

    # ChannelExchange only flips the sign of diff on exchanged channels.
    ch = lax.broadcasted_iota(jnp.int32, (1, c, 1), 1)
    sgn = jnp.where((ch % EXCHANGE_P) == 0, -1.0, 1.0).astype(d.dtype)

    w1 = jnp.broadcast_to(w1_ref[...][None], (bn, hid, c))         # bf16, tiny
    w2 = w2_ref[...]                                               # (C, HID) f32

    # fc1 on the MXU (bf16 operands, f32 accumulate).  keep*sgn is folded into w1.
    g = jnp.einsum('boc,bct->bot', w1, d.astype(jnp.bfloat16),
                   preferred_element_type=jnp.float32)             # (Bn, HID, HW)
    h = jnp.maximum(g, 0.0)                                        # per-pixel branch
    # fc1 is linear => fc1(avgpool(diff_temp)) == mean over HW of g.
    hm = jnp.maximum(jnp.mean(g, axis=-1, keepdims=True), 0.0)     # (Bn, HID, 1) global branch

    # fc2 for both branches fused:  z = avg_out + ori_out = sum_j w2[:, j] * (h_j + hm_j)
    if hid <= 8:
        # K is tiny -> unrolled VPU multiply-adds (MXU would be <5% utilized).
        z = w2[:, 0:1][None] * (h[:, 0:1, :] + hm[:, 0:1, :])
        for j in range(1, hid):
            z = z + w2[:, j:j + 1][None] * (h[:, j:j + 1, :] + hm[:, j:j + 1, :])
    else:
        w2b = jnp.broadcast_to(w2.astype(jnp.bfloat16)[None], (bn, c, hid))
        z = jnp.einsum('bco,bot->bct', w2b, (h + hm).astype(jnp.bfloat16),
                       preferred_element_type=jnp.float32)

    # out = diff*(1+att), att = sigmoid(z) = 0.5*(tanh(z/2)+1)  (single EUP op)
    out_ref[...] = (d * sgn * (1.5 + 0.5 * jnp.tanh(0.5 * z))).astype(out_ref.dtype)


def _tiled_kernel(x1_ref, x2_ref, avg_ref, w1_ref, w2_ref, out_ref):
    # Fallback path.  x1/x2/out: (1, C, T)   avg: (1, C, 1) precomputed fc2(relu(fc1(avgpool)))
    d = x1_ref[0] - x2_ref[0]                                      # (C, T) f32
    c = d.shape[0]
    hid = w1_ref.shape[0]

    ch = lax.broadcasted_iota(jnp.int32, (c, 1), 0)
    sgn = jnp.where((ch % EXCHANGE_P) == 0, -1.0, 1.0).astype(d.dtype)

    w1 = w1_ref[...]                                               # (HID, C) bf16
    w2 = w2_ref[...]                                               # (C, HID) f32

    h = jnp.maximum(jnp.dot(w1, d.astype(jnp.bfloat16),
                            preferred_element_type=jnp.float32), 0.0)   # (HID, T)
    if hid <= 8:
        z = w2[:, 0:1] * h[0:1, :]
        for j in range(1, hid):
            z = z + w2[:, j:j + 1] * h[j:j + 1, :]
    else:
        z = jnp.dot(w2.astype(jnp.bfloat16), h.astype(jnp.bfloat16),
                    preferred_element_type=jnp.float32)
    z = z + avg_ref[0]                                             # (C, 1) broadcasts over lanes

    out_ref[0] = (d * sgn * (1.5 + 0.5 * jnp.tanh(0.5 * z))).astype(out_ref.dtype)


# --------------------------------------------------------------------------------------
# Sizing helpers (generation-aware VMEM budgeting)
# --------------------------------------------------------------------------------------
def _vmem_limit_bytes():
    cap = None
    try:
        info = pltpu.get_tpu_info()
        cap = int(getattr(info, "vmem_capacity_bytes", 0)) or None
    except Exception:
        cap = None
    if cap is None:
        cap = 64 << 20                      # safe lower bound (v7x: 64 MiB, v5e/v6e: 128 MiB)
    cap = min(max(cap, 64 << 20), 128 << 20)
    return (cap * 3) // 4                   # leave headroom for compiler-internal scratch


def _pick_batch_group(n, slab_bytes, vmem_limit):
    """Batch elements per grid step for the fused path."""
    by_vmem = max(1, vmem_limit // (10 * max(slab_bytes, 1)))   # 6 dbl-buffered I/O + ~4 f32 temps
    target = max(1, -(-(1 << 20) // max(slab_bytes, 1)))        # >= ~1 MiB DMAs for tiny HW
    bn = min(by_vmem, target)
    if n >= 2:
        bn = min(bn, n // 2)      # keep >= 2 grid steps for the two TensorCores on v7x
    bn = max(1, min(bn, n))
    while n % bn:                 # exact grid (no boundary masking)
        bn -= 1
    return bn


def _pick_hw_tile(hw, c, itemsize, vmem_limit):
    """Lane tile for the fallback path: a multiple of 128 lanes within the VMEM budget."""
    per_lane = 10 * c * itemsize
    t = (vmem_limit // per_lane) // 128 * 128
    return int(min(hw, max(512, t)))


# --------------------------------------------------------------------------------------
# Wrapper
# --------------------------------------------------------------------------------------
def dim_forward(x1_nchw, x2_nchw, w1, w2, *, force_tiled=False, hw_tile=None):
    """x1/x2: (N, C, H, W) f32.   w1: (HID, C, 1, 1)   w2: (C, HID, 1, 1)   (1x1 convs, no bias)."""
    n, c, h, w = x1_nchw.shape
    hid = w1.shape[0]
    hw = h * w
    itemsize = x1_nchw.dtype.itemsize

    # Free reshapes: (N, C, HW) keeps HW on the lane axis (lane-dense loads/stores).
    x1 = x1_nchw.reshape(n, c, hw)
    x2 = x2_nchw.reshape(n, c, hw)

    ch = jnp.arange(c)
    sgn = jnp.where((ch % EXCHANGE_P) == 0, -1.0, 1.0).astype(jnp.float32)
    keep = jnp.where((ch % MASK_P) != 0, 1.0, 0.0).astype(jnp.float32)
    w1m = w1.reshape(hid, c).astype(jnp.float32)
    w2m = w2.reshape(c, hid).astype(jnp.float32)
    w1s_f32 = w1m * (sgn * keep)[None, :]          # fold ChannelExchange sign + PerturbMask into fc1
    w1s = w1s_f32.astype(jnp.bfloat16)             # MXU operands in bf16 (f32 accumulation)

    vmem_limit = _vmem_limit_bytes()
    slab_bytes = c * hw * itemsize
    flops = 4 * hid * c * hw * n
    transcendentals = n * c * hw

    fused_ok = (10 * slab_bytes <= vmem_limit) and not force_tiled

    if fused_ok:
        # ---- fully fused path: 2 reads + 1 write of HBM, avg-pool branch in-kernel ----
        bn = _pick_batch_group(n, slab_bytes, vmem_limit)
        grid = (n // bn,)
        out = pl.pallas_call(
            _fused_kernel,
            out_shape=jax.ShapeDtypeStruct((n, c, hw), x1.dtype),
            grid_spec=pltpu.PrefetchScalarGridSpec(
                num_scalar_prefetch=0,
                grid=grid,
                in_specs=[
                    pl.BlockSpec((bn, c, hw), lambda b: (b, 0, 0)),
                    pl.BlockSpec((bn, c, hw), lambda b: (b, 0, 0)),
                    pl.BlockSpec((hid, c), lambda b: (0, 0)),
                    pl.BlockSpec((c, hid), lambda b: (0, 0)),
                ],
                out_specs=pl.BlockSpec((bn, c, hw), lambda b: (b, 0, 0)),
            ),
            compiler_params=pltpu.CompilerParams(
                dimension_semantics=("parallel",),
                vmem_limit_bytes=vmem_limit),
            cost_estimate=pl.CostEstimate(
                flops=flops, transcendentals=transcendentals,
                bytes_accessed=3 * n * c * hw * itemsize),
        )(x1, x2, w1s, w2m)
    else:
        # ---- fallback for slabs that cannot fit VMEM: tile HW, hoist the avg-pool branch ----
        d_mean = x1_nchw.mean(axis=(2, 3)) - x2_nchw.mean(axis=(2, 3))      # (N, C)
        avg_h = jnp.maximum(d_mean @ w1s_f32.T, 0.0)                        # (N, HID)
        avg_out = (avg_h @ w2m.T)[:, :, None].astype(jnp.float32)           # (N, C, 1)

        tile_hw = hw_tile if hw_tile is not None else _pick_hw_tile(hw, c, itemsize, vmem_limit)
        grid = (n, pl.cdiv(hw, tile_hw))
        out = pl.pallas_call(
            _tiled_kernel,
            out_shape=jax.ShapeDtypeStruct((n, c, hw), x1.dtype),
            grid_spec=pltpu.PrefetchScalarGridSpec(
                num_scalar_prefetch=0,
                grid=grid,
                in_specs=[
                    pl.BlockSpec((1, c, tile_hw), lambda b, t: (b, 0, t)),
                    pl.BlockSpec((1, c, tile_hw), lambda b, t: (b, 0, t)),
                    pl.BlockSpec((1, c, 1), lambda b, t: (b, 0, 0)),
                    pl.BlockSpec((hid, c), lambda b, t: (0, 0)),
                    pl.BlockSpec((c, hid), lambda b, t: (0, 0)),
                ],
                out_specs=pl.BlockSpec((1, c, tile_hw), lambda b, t: (b, 0, t)),
            ),
            compiler_params=pltpu.CompilerParams(
                dimension_semantics=("parallel", "parallel"),
                vmem_limit_bytes=vmem_limit),
            cost_estimate=pl.CostEstimate(
                flops=flops, transcendentals=transcendentals,
                bytes_accessed=5 * n * c * hw * itemsize),
        )(x1, x2, avg_out, w1s, w2m)

    return out.reshape(n, c, h, w)


# --------------------------------------------------------------------------------------
# Pure-JAX reference (mirrors the PyTorch module)
# --------------------------------------------------------------------------------------
def dim_reference(x1, x2, w1, w2):
    n, c, h, w_ = x1.shape
    hid = w1.shape[0]
    ch = jnp.arange(c)
    ex = ((ch % EXCHANGE_P) == 0)[None, :, None, None]
    in1 = jnp.where(ex, x2, x1)
    in2 = jnp.where(ex, x1, x2)
    diff = in1 - in2
    keep = ((ch % MASK_P) != 0)[None, :, None, None]
    dt = jnp.where(keep, diff, 0.0)
    w1m = w1.reshape(hid, c)
    w2m = w2.reshape(c, hid)
    avg = dt.mean(axis=(2, 3))                                   # (N, C)
    avg_h = jnp.maximum(avg @ w1m.T, 0.0)
    avg_out = (avg_h @ w2m.T)[:, :, None, None]
    ori_h = jnp.maximum(jnp.einsum('nchw,oc->nohw', dt, w1m), 0.0)
    ori_out = jnp.einsum('nohw,co->nchw', ori_h, w2m)
    att = jax.nn.sigmoid(avg_out + ori_out)
    f1 = in1 * att + in1
    f2 = in2 * att + in2
    return f1 - f2


if __name__ == "__main__":
    N, C, H, W = 2, 32, 16, 16
    HID = C // 16

    key = jax.random.PRNGKey(0)
    k1, k2, k3, k4 = jax.random.split(key, 4)
    x1 = jax.random.normal(k1, (N, C, H, W), dtype=jnp.float32)
    x2 = jax.random.normal(k2, (N, C, H, W), dtype=jnp.float32)
    # deterministic 1x1 "conv" weights (bias-free)
    w1 = jax.random.normal(k3, (HID, C, 1, 1), dtype=jnp.float32) * 0.1
    w2 = jax.random.normal(k4, (C, HID, 1, 1), dtype=jnp.float32) * 0.1

    ref = jax.block_until_ready(dim_reference(x1, x2, w1, w2))

    # Primary (fused) path.
    out_fused = jax.block_until_ready(dim_forward(x1, x2, w1, w2))
    assert out_fused.shape == (N, C, H, W)
    assert jnp.allclose(out_fused, ref, rtol=2e-3, atol=2e-3), \
        float(jnp.max(jnp.abs(out_fused - ref)))

    # Also exercise the large-HW fallback path (forced, small lane tile).
    out_tiled = jax.block_until_ready(
        dim_forward(x1, x2, w1, w2, force_tiled=True, hw_tile=128))
    assert jnp.allclose(out_tiled, ref, rtol=2e-3, atol=2e-3), \
        float(jnp.max(jnp.abs(out_tiled - ref)))

    print("KERNEL_OK")
</pallas_src>

<mosaic_0001>
module attributes {stable_mosaic.version = 11 : i64} {
  func.func @_fused_kernel(%arg0: i32, %arg1: memref<1x32x256xf32, #tpu.memory_space<vmem>>, %arg2: memref<1x32x256xf32, #tpu.memory_space<vmem>>, %arg3: memref<2x32xbf16, #tpu.memory_space<vmem>>, %arg4: memref<32x2xf32, #tpu.memory_space<vmem>>, %arg5: memref<1x32x256xf32, #tpu.memory_space<vmem>>) attributes {dimension_semantics = [#tpu.dimension_semantics<parallel>], iteration_bounds = array<i64: 2>, scalar_prefetch = 0 : i64, scratch_operands = 0 : i64, tpu.core_type = #tpu.core_type<tc>, window_params = [{transform_indices = @transform_0, window_bounds = array<i64: 1, 32, 256>}, {transform_indices = @transform_1, window_bounds = array<i64: 1, 32, 256>}, {pipeline_mode = #tpu.pipeline_mode<synchronous>, transform_indices = @transform_2, window_bounds = array<i64: 2, 32>}, {pipeline_mode = #tpu.pipeline_mode<synchronous>, transform_indices = @transform_3, window_bounds = array<i64: 32, 2>}, {transform_indices = @transform_4, window_bounds = array<i64: 1, 32, 256>}]} {
    %c0 = arith.constant 0 : index
    %c0_0 = arith.constant 0 : index
    %c0_1 = arith.constant 0 : index
    %0 = vector.load %arg1[%c0, %c0_0, %c0_1] : memref<1x32x256xf32, #tpu.memory_space<vmem>>, vector<1x32x256xf32>
    %c0_2 = arith.constant 0 : index
    %c0_3 = arith.constant 0 : index
    %c0_4 = arith.constant 0 : index
    %1 = vector.load %arg2[%c0_2, %c0_3, %c0_4] : memref<1x32x256xf32, #tpu.memory_space<vmem>>, vector<1x32x256xf32>
    %2 = arith.subf %0, %1 : vector<1x32x256xf32>
    %3 = tpu.iota {dimensions = array<i32: 1>} : vector<1x32x1xi32>
    %c2_i32 = arith.constant 2 : i32
    %c0_i32 = arith.constant 0 : i32
    %4 = arith.cmpi eq, %c2_i32, %c0_i32 : i32
    %c1_i32 = arith.constant 1 : i32
    %5 = arith.select %4, %c1_i32, %c2_i32 : i32
    %6 = vector.broadcast %5 : i32 to vector<1x32x1xi32>
    %7 = arith.remsi %3, %6 : vector<1x32x1xi32>
    %c0_i32_5 = arith.constant 0 : i32
    %8 = vector.broadcast %c0_i32_5 : i32 to vector<1x32x1xi32>
    %9 = arith.cmpi ne, %7, %8 : vector<1x32x1xi32>
    %c0_i32_6 = arith.constant 0 : i32
    %10 = vector.broadcast %c0_i32_6 : i32 to vector<1x32x1xi32>
    %11 = arith.cmpi slt, %7, %10 : vector<1x32x1xi32>
    %c0_i32_7 = arith.constant 0 : i32
    %12 = arith.cmpi slt, %5, %c0_i32_7 : i32
    %13 = vector.broadcast %12 : i1 to vector<1x32x1xi1>
    %14 = vector.broadcast %13 : vector<1x32x1xi1> to vector<1x32x1xi1>
    %15 = arith.xori %11, %14 : vector<1x32x1xi1>
    %16 = arith.andi %15, %9 : vector<1x32x1xi1>
    %17 = vector.broadcast %5 : i32 to vector<1x32x1xi32>
    %18 = arith.addi %7, %17 : vector<1x32x1xi32>
    %19 = arith.select %16, %18, %7 : vector<1x32x1xi1>, vector<1x32x1xi32>
    %c0_i32_8 = arith.constant 0 : i32
    %20 = vector.broadcast %c0_i32_8 : i32 to vector<1x32x1xi32>
    %21 = arith.cmpi eq, %19, %20 : vector<1x32x1xi32>
    %cst = arith.constant -1.000000e+00 : f32
    %cst_9 = arith.constant 1.000000e+00 : f32
    %22 = vector.broadcast %cst : f32 to vector<1x32x1xf32>
    %23 = vector.broadcast %cst_9 : f32 to vector<1x32x1xf32>
    %24 = arith.select %21, %22, %23 : vector<1x32x1xi1>, vector<1x32x1xf32>
    %c0_10 = arith.constant 0 : index
    %c0_11 = arith.constant 0 : index
    %25 = vector.load %arg3[%c0_10, %c0_11] : memref<2x32xbf16, #tpu.memory_space<vmem>>, vector<2x32xbf16>
    %26 = vector.shape_cast %25 : vector<2x32xbf16> to vector<1x2x32xbf16>
    %c0_12 = arith.constant 0 : index
    %c0_13 = arith.constant 0 : index
    %27 = vector.load %arg4[%c0_12, %c0_13] : memref<32x2xf32, #tpu.memory_space<vmem>>, vector<32x2xf32>
    %28 = arith.truncf %2 : vector<1x32x256xf32> to vector<1x32x256xbf16>
    "tpu.trace_start"() <{level = 10 : i32, message = "boc,bct->bot"}> : () -> ()
    %cst_14 = arith.constant dense<0.000000e+00> : vector<1x2x256xf32>
    %29 = tpu.matmul %26, %28, %cst_14 {dimension_numbers = #tpu.dot_dimension_numbers<[2], [1], [1], [2], [0, 0, 0, 1, 1, 2], [0], [0]>} : vector<1x2x32xbf16>, vector<1x32x256xbf16>, vector<1x2x256xf32> -> vector<1x2x256xf32>
    "tpu.trace_stop"() : () -> ()
    %cst_15 = arith.constant 0.000000e+00 : f32
    %30 = vector.broadcast %cst_15 : f32 to vector<1x2x256xf32>
    %31 = arith.maximumf %29, %30 : vector<1x2x256xf32>
    %cst_16 = arith.constant dense<0.000000e+00> : vector<1x2xf32>
    %32 = vector.multi_reduction <add>, %29, %cst_16 [2] : vector<1x2x256xf32> to vector<1x2xf32>
    %33 = vector.shape_cast %32 : vector<1x2xf32> to vector<1x2x1xf32>
    %cst_17 = arith.constant 2.560000e+02 : f32
    %34 = vector.broadcast %cst_17 : f32 to vector<1x2x1xf32>
    %35 = arith.divf %33, %34 : vector<1x2x1xf32>
    %cst_18 = arith.constant 0.000000e+00 : f32
    %36 = vector.broadcast %cst_18 : f32 to vector<1x2x1xf32>
    %37 = arith.maximumf %35, %36 : vector<1x2x1xf32>
    %38 = vector.extract_strided_slice %27 {offsets = [0, 0], sizes = [32, 1], strides = [1, 1]} : vector<32x2xf32> to vector<32x1xf32>
    %39 = vector.shape_cast %38 : vector<32x1xf32> to vector<1x32x1xf32>
    %40 = vector.extract_strided_slice %31 {offsets = [0, 0, 0], sizes = [1, 1, 256], strides = [1, 1, 1]} : vector<1x2x256xf32> to vector<1x1x256xf32>
    %41 = vector.extract_strided_slice %37 {offsets = [0, 0, 0], sizes = [1, 1, 1], strides = [1, 1, 1]} : vector<1x2x1xf32> to vector<1x1x1xf32>
    %42 = vector.broadcast %41 : vector<1x1x1xf32> to vector<1x1x256xf32>
    %43 = arith.addf %40, %42 : vector<1x1x256xf32>
    %44 = vector.broadcast %39 : vector<1x32x1xf32> to vector<1x32x256xf32>
    %45 = vector.broadcast %43 : vector<1x1x256xf32> to vector<1x32x256xf32>
    %46 = arith.mulf %44, %45 : vector<1x32x256xf32>
    %47 = vector.extract_strided_slice %27 {offsets = [0, 1], sizes = [32, 1], strides = [1, 1]} : vector<32x2xf32> to vector<32x1xf32>
    %48 = vector.shape_cast %47 : vector<32x1xf32> to vector<1x32x1xf32>
    %49 = vector.extract_strided_slice %31 {offsets = [0, 1, 0], sizes = [1, 1, 256], strides = [1, 1, 1]} : vector<1x2x256xf32> to vector<1x1x256xf32>
    %50 = vector.extract_strided_slice %37 {offsets = [0, 1, 0], sizes = [1, 1, 1], strides = [1, 1, 1]} : vector<1x2x1xf32> to vector<1x1x1xf32>
    %51 = vector.broadcast %50 : vector<1x1x1xf32> to vector<1x1x256xf32>
    %52 = arith.addf %49, %51 : vector<1x1x256xf32>
    %53 = vector.broadcast %48 : vector<1x32x1xf32> to vector<1x32x256xf32>
    %54 = vector.broadcast %52 : vector<1x1x256xf32> to vector<1x32x256xf32>
    %55 = arith.mulf %53, %54 : vector<1x32x256xf32>
    %56 = arith.addf %46, %55 : vector<1x32x256xf32>
    %57 = vector.broadcast %24 : vector<1x32x1xf32> to vector<1x32x256xf32>
    %58 = arith.mulf %2, %57 : vector<1x32x256xf32>
    %cst_19 = arith.constant 5.000000e-01 : f32
    %59 = vector.broadcast %cst_19 : f32 to vector<1x32x256xf32>
    %60 = arith.mulf %59, %56 : vector<1x32x256xf32>
    %61 = math.tanh %60 : vector<1x32x256xf32>
    %cst_20 = arith.constant 5.000000e-01 : f32
    %62 = vector.broadcast %cst_20 : f32 to vector<1x32x256xf32>
    %63 = arith.mulf %62, %61 : vector<1x32x256xf32>
    %cst_21 = arith.constant 1.500000e+00 : f32
    %64 = vector.broadcast %cst_21 : f32 to vector<1x32x256xf32>
    %65 = arith.addf %64, %63 : vector<1x32x256xf32>
    %66 = arith.mulf %58, %65 : vector<1x32x256xf32>
    %c0_22 = arith.constant 0 : index
    %c0_23 = arith.constant 0 : index
    %c0_24 = arith.constant 0 : index
    %67 = vector.load %arg5[%c0_22, %c0_23, %c0_24] : memref<1x32x256xf32, #tpu.memory_space<vmem>>, vector<1x32x256xf32>
    tpu.vector_store %arg5[%c0_22, %c0_23, %c0_24], %66 {strides = array<i32>} : memref<1x32x256xf32, #tpu.memory_space<vmem>>, vector<1x32x256xf32>,
    return
  }
  func.func @transform_0(%arg0: i32) -> (i32, i32, i32) {
    %c0_i32 = arith.constant 0 : i32
    %c0_i32_0 = arith.constant 0 : i32
    %c0_i32_1 = arith.constant 0 : i32
    return %arg0, %c0_i32, %c0_i32_0 : i32, i32, i32
  }
  func.func @transform_1(%arg0: i32) -> (i32, i32, i32) {
    %c0_i32 = arith.constant 0 : i32
    %c0_i32_0 = arith.constant 0 : i32
    %c0_i32_1 = arith.constant 0 : i32
    return %arg0, %c0_i32, %c0_i32_0 : i32, i32, i32
  }
  func.func @transform_2(%arg0: i32) -> (i32, i32) {
    %c0_i32 = arith.constant 0 : i32
    %c0_i32_0 = arith.constant 0 : i32
    %c0_i32_1 = arith.constant 0 : i32
    return %c0_i32, %c0_i32_0 : i32, i32
  }
  func.func @transform_3(%arg0: i32) -> (i32, i32) {
    %c0_i32 = arith.constant 0 : i32
    %c0_i32_0 = arith.constant 0 : i32
    %c0_i32_1 = arith.constant 0 : i32
    return %c0_i32, %c0_i32_0 : i32, i32
  }
  func.func @transform_4(%arg0: i32) -> (i32, i32, i32) {
    %c0_i32 = arith.constant 0 : i32
    %c0_i32_0 = arith.constant 0 : i32
    %c0_i32_1 = arith.constant 0 : i32
    return %arg0, %c0_i32, %c0_i32_0 : i32, i32, i32
  }
}

</mosaic_0001>

<bundles_post_ra>
// kernel: tpu_custom_call.1
= control target key start
LH: loop header
LB: loop body
LE: loop exit
PB: predicated region body
PF: predicated region fallthrough
CT: control target
= control target key end

     0   :  { %9 = vsyncpa [#allocation3], 0  ;;  %s1200_s0 = inlined_call_operand.hbm [shape: f32[2,32,256], index: 0, kind: input, shape index: {}]   ;;  %s1201_s1 = inlined_call_operand.hbm [shape: f32[2,32,256], index: 1, kind: input, shape index: {}]   ;;  %s1202_s2 = inlined_call_operand.vmem [shape: bf16[2,32], index: 2, kind: input, shape index: {}]   ;;  %s1203_s3 = inlined_call_operand.vmem [shape: f32[32,2], index: 3, kind: input, shape index: {}]   ;;  %s1204_s4 = inlined_call_operand.hbm [shape: f32[2,32,256], index: 4, kind: output, shape index: {}]  }
   0x1   :  { %11 = vsyncpa [#allocation3 + $0x1], 0 }
   0x2   :  { %12 = vsyncpa [#allocation6], 0 }
   0x3   :  { %14 = vsyncpa [#allocation6 + $0x1], 0 }
   0x4   :  { %15 = vsyncpa [#allocation4], 0 }
   0x5   :  { %17 = vsyncpa [#allocation4 + $0x1], 0  ;;  %s912_s15 = smov 0   ;;  %s914_s16 = smov 0  }
   0x6   :  { %s916_s17 = smov 0   ;;  %s918_s18 = smov 0  }
   0x7 LB: > { %s933_s19 = sadd.s32 4294967295, %s875_s18   ;;  %s651_s20 = sadd.s32 4294967294, %s875_s18   ;;  %s875_s18 = sphi %s918_s18, %s1220_s18   ;;  %s871_s17 = sphi %s916_s17, %s1219_s17   ;;  %s867_s16 = sphi %s914_s16, %s1218_s16   ;;  %s863_s15 = sphi %s912_s15, %s1217_s15  }
   0x8   : > { %s937_s21 = sadd.s32 1, %s875_s18   ;;  %s30_s22 = sadd.s32 1, %s871_s17 }
   0x9   : > { %s27_s23 = ssub.s32 %s875_s18, %s937_s21  ;;  %p37_p0 = scmp.ne.s32.totalorder %s871_s17, %s867_s16 }
   0xa   : > { %p28_p1 = scmp.eq.s32.totalorder %s27_s23, 0  ;;  %p38_p2 = scmp.eq.s32.totalorder %s875_s18, 0 }
   0xb   : > { %p43_p3 = scmp.ne.s32.totalorder %s867_s16, %s863_s15  ;;  %p44_p4 = scmp.eq.s32.totalorder %s933_s19, 0 }
   0xc   : > { %s949_s24 = scalar_select %p28_p1, %s871_s17, %s30_s22  }
   0xd   : > { %p951_p5 = por %p38_p2, %p37_p0  ;;  %p955_p6 = por %p44_p4, %p43_p3 }
   0xe   : > { %p135_p7 = scmp.eq.s32.totalorder %s933_s19, 1  ;;  %p141_p8 = scmp.eq.s32.totalorder %s651_s20, 1 }
   0xf   : > { %s1208_s26 = scalar_select %p955_p6, 1, 0 }
  0x10   : > { %p690_p10 = scmp.lt.s32.totalorder %s875_s18, 2  ;;  %p962_p11 = por %p135_p7, %p37_p0 }
  0x11   : > { %p966_p12 = por %p141_p8, %p43_p3  ;;  %s971_s29 = sand.u32 1, %s871_s17  }
  0x12   : > { %s1209_s27 = scalar_select %p962_p11, 1, 0 }
  0x13   : > { %s1210_s28 = scalar_select %p966_p12, 1, 0 }
  0x14   : > { %s670_s30 = sshll.u32 %s875_s18, 10  ;;  %s654_s5 = sshll.u32 %s971_s29, 6 }
  0x15   : > { %s980_s8 = scalar_lea.hbm %s1200_s0, %s670_s30  ;;  %s171_s9 = scalar_lea.vmem [#allocation2], %s654_s5 }
  0x16   : > { %s178_s10 = sshll.u32 %s171_s9, 4  ;;  %p986_p13 = pnand %p690_p10, %p951_p5  ;;  %s990_s10 = int_to_ptr.vmem [resolvable:$true] %s178_s10 }
  0x17   : > { %s168_s12 = scalar_lea.sflag [#allocation3], %s971_s29  ;;  %s751_s13 = scalar_lea.hbm %s980_s8, 1024 }
  0x18   : > { %p752_p0 = scmp.ne.s32.totalorder %s980_s8, %s751_s13  ;;  %p753_p1 = pneg %p986_p13 }
  0x19   : > { %s756_s22 = scalar_lea.hbm %s1200_s0, 2048  ;;  %p757_p4 = scmp.lt.s32.totalorder %s980_s8, %s1200_s0 }
  0x1a   : > { %p754_p2 = pnand %p753_p1, %p752_p0  ;;  %p758_p5 = scmp.lt.s32.totalorder %s756_s22, %s751_s13 }
  0x1c   : > { %p755_p3 = pneg %p754_p2  ;;  %p759_p7 = por %p758_p5, %p757_p4 }
  0x1e   : > { %p760_p8 = pnand %p759_p7, %p755_p3 }
  0x20   : > { %763 = shalt.err (!%p760_p8)
}
  0x21   : > { %s764_s6 = scalar_lea.vmem %s990_s10, 1024  ;;  %s877_s7 = smov [#allocation2]  }
  0x22   : > { %p765_p10 = scmp.ne.s32.totalorder %s990_s10, %s764_s6  ;;  %s769_s9 = sshll.u32 %s877_s7, 4  ;;  %s770_s9 = int_to_ptr.vmem [resolvable:$false] %s769_s9 }
  0x23   : > { %s771_s14 = scalar_lea.vmem %s770_s9, 2048  ;;  %p772_p9 = scmp.lt.s32.totalorder %s990_s10, %s770_s9 }
  0x24   : > { %p767_p0 = pnand %p765_p10, %p753_p1  ;;  %p773_p12 = scmp.lt.s32.totalorder %s771_s14, %s764_s6 }
  0x26   : > { %p768_p2 = pneg %p767_p0  ;;  %p774_p11 = por %p773_p12, %p772_p9 }
  0x28   : > { %p775_p4 = pnand %p774_p11, %p768_p2 }
  0x2a   : > { %778 = shalt.err (!%p775_p4)
}
  0x2b   : > { %s878_s13 = smov 256   ;;  %s879_s20 = smov 16  }
  0x2c   : > { %682 = dma.hbm_to_vmem [thread:$0]  (!%p986_p13), %s980_s8, 1024, %s990_s10, %s168_s12, %s878_s13, %s878_s13, %s879_s20  }
  0x2d   : > { %p660_p9 = scmp.ge.s32.totalorder %s875_s18, 1  ;;  %p207_p11 = scmp.lt.s32.totalorder %s875_s18, 3 }
  0x2e   : > { %s1033_s6 = scalar_lea.hbm %s1201_s1, %s670_s30  ;;  %s192_s7 = scalar_lea.vmem [#allocation5], %s654_s5 }
  0x2f   : > { %p1024_p12 = pnand %p660_p9, %p207_p11  ;;  %s199_s9 = sshll.u32 %s192_s7, 4  ;;  %s1037_s9 = int_to_ptr.vmem [resolvable:$true] %s199_s9 }
  0x30   : > { %s189_s8 = scalar_lea.sflag [#allocation6], %s971_s29  ;;  %s779_s10 = scalar_lea.hbm %s1033_s6, 1024 }
  0x31   : > { %p780_p3 = scmp.ne.s32.totalorder %s1033_s6, %s779_s10  ;;  %s784_s30 = scalar_lea.hbm %s1201_s1, 2048 }
  0x32   : > { %p785_p8 = scmp.lt.s32.totalorder %s1033_s6, %s1201_s1  ;;  %p786_p10 = scmp.lt.s32.totalorder %s784_s30, %s779_s10 }
  0x33   : > { %p782_p5 = pnand %p780_p3, %p753_p1 }
  0x34   : > { %p787_p0 = por %p786_p10, %p785_p8 }
  0x35   : > { %p783_p7 = pneg %p782_p5 }
  0x37   : > { %p788_p2 = pnand %p787_p0, %p783_p7 }
  0x39   : > { %791 = shalt.err (!%p788_p2)
}
  0x3a   : > { %s792_s29 = scalar_lea.vmem %s1037_s9, 1024  ;;  %s880_s5 = smov [#allocation5]  }
  0x3b   : > { %p793_p4 = scmp.ne.s32.totalorder %s1037_s9, %s792_s29  ;;  %s797_s7 = sshll.u32 %s880_s5, 4  ;;  %s798_s7 = int_to_ptr.vmem [resolvable:$false] %s797_s7 }
  0x3c   : > { %s799_s12 = scalar_lea.vmem %s798_s7, 2048  ;;  %p800_p3 = scmp.lt.s32.totalorder %s1037_s9, %s798_s7 }
  0x3d   : > { %p795_p9 = pnand %p793_p4, %p753_p1  ;;  %p801_p5 = scmp.lt.s32.totalorder %s799_s12, %s792_s29 }
  0x3f   : > { %p796_p11 = pneg %p795_p9  ;;  %p802_p6 = por %p801_p5, %p800_p3 }
  0x41   : > { %p803_p8 = pnand %p802_p6, %p796_p11 }
  0x43   : > { %806 = shalt.err (!%p803_p8)
}
  0x44   : > { %685 = dma.hbm_to_vmem [thread:$0]  (!%p986_p13), %s1033_s6, 1024, %s1037_s9, %s189_s8, %s878_s13, %s878_s13, %s879_s20  }
  0x45   : > { %211 = sbr.rel (%p1024_p12) target bundleno = 484 (0x1e4), region = 36  ;;  %s1068_s10 = sand.u32 (!%p1024_p12), 1, %s867_s16  }
  0x46   : > { %s1071_s14 = sshll.u32 (!%p1024_p12), %s1068_s10, 6  ;;  %s214_s30 = scalar_lea.sflag (!%p1024_p12), [#allocation3], %s1068_s10 }
  0x47   : > { %s1075_s11 = scalar_lea.vmem (!%p1024_p12), [#allocation2], %s1071_s14  ;;  %p1213_p6 = scmp.ne.s32.totalorder (!%p1024_p12), %s1208_s26, 0 }
  0x4a   : > { %850 = dma.done.wait (%p1213_p6), %s214_s30, 1024  }
  0x4b   : > { %852 = vsyncadd (%p1213_p6), %s214_s30, 4294966272  ;;  %s223_s13 = scalar_lea.sflag [#allocation6], %s1068_s10  ;;  %s226_s20 = scalar_lea.vmem [#allocation5], %s1071_s14 }
  0x4c   : > { %854 = dma.done.wait (%p1213_p6), %s223_s13, 1024  }
  0x4d   : > { %856 = vsyncadd (%p1213_p6), %s223_s13, 4294966272  ;;  %v881_v0 = vmov 0   ;;  %v262_v1 = vld [vmem:[%s1075_s11 + $0x28] sm:$0xff]  ;;  %v264_v2 = vld [vmem:[%s1075_s11 + $0x38] sm:$0xff]  ;;  %vm351_vm0 = vcmask 261120   ;;  %v882_v33 = vmov 1   ;;  %v281_v46 = vlaneseq }
  0x4e   : > { %387 = vmatprep.mubr.bf16.mxu0 %v881_v0  ;;  %732 = vset.pattern.permute.xlu1 %v881_v0  ;;  %v270_v3 = vld [vmem:[%s226_s20 + $0x28] sm:$0xff]  ;;  %v272_v4 = vld [vmem:[%s226_s20 + $0x38] sm:$0xff]  ;;  %v261_v6 = vld [vmem:[%s1075_s11 + $0x20] sm:$0xff]  ;;  %vm398_vm1 = vcmask 1041408   ;;  %s255_s12 = scalar_lea.vmem [#allocation7], %s1071_s14  ;;  %s672_s30 = sshll.u32 %s933_s19, 10 }
  0x4f   : > { %731 = vset.pattern.permute.xlu0 %v881_v0  ;;  %v1089_v5 = vsub.f32 %v262_v1, %v270_v3  ;;  %v263_v7 = vld [vmem:[%s1075_s11 + $0x30] sm:$0xff]  ;;  %v1093_v8 = vsub.f32 %v264_v2, %v272_v4  ;;  %v269_v9 = vld [vmem:[%s226_s20 + $0x20] sm:$0xff]  ;;  %v258_v11 = vld [vmem:[%s1075_s11 + $0x8] sm:$0xff]  ;;  %v1134_v47 = vshrl.u32 %v281_v46, 7  ;;  %s542_s19 = scalar_lea.sflag [#allocation4], %s1068_s10  ;;  %p1214_p1 = scmp.ne.s32.totalorder %s1209_s27, 0 }
  0x50   : > { %v271_v10 = vld [vmem:[%s226_s20 + $0x30] sm:$0xff]  ;;  %v1096_v12 = vsub.f32 %v261_v6, %v269_v9  ;;  %v260_v14 = vld [vmem:[%s1075_s11 + $0x18] sm:$0xff]  ;;  %v266_v15 = vld [vmem:[%s226_s20 + $0x8] sm:$0xff]  ;;  %s884_s22 = smov [#allocation7]  }
  0x51   : > { %v1098_v13 = vsub.f32 %v263_v7, %v271_v10  ;;  %v268_v16 = vld [vmem:[%s226_s20 + $0x18] sm:$0xff]  ;;  %v350_v17 = vpack.c.bf16 %v1093_v8, %v1089_v5  ;;  %v1103_v18 = vsub.f32 %v258_v11, %v266_v15  ;;  %v257_v20 = vld [vmem:[%s1075_s11] sm:$0xff]  ;;  %v259_v21 = vld [vmem:[%s1075_s11 + $0x10] sm:$0xff]  ;;  %v431_v51 = vsub.s32 0, %v1134_v47  ;;  %s555_s11 = sshll.u32 %s255_s12, 4  ;;  %s811_s6 = sshll.u32 %s884_s22, 4  ;;  %s1157_s11 = int_to_ptr.vmem [resolvable:$true] %s555_s11  ;;  %s812_s6 = int_to_ptr.vmem [resolvable:$false] %s811_s6 }
  0x52   : > { %v1105_v19 = vsub.f32 %v260_v14, %v268_v16  ;;  %v265_v22 = vld [vmem:[%s226_s20] sm:$0xff]  ;;  %v267_v24 = vld [vmem:[%s226_s20 + $0x10] sm:$0xff]  ;;  %v344_v26 = vld [vmem:[%s1203_s3 + $0x8] sm:$0xff]  ;;  %v463_v54 = vsub.s32 1, %v1134_v47  ;;  %s1155_s20 = scalar_lea.hbm %s1204_s4, %s672_s30  ;;  %s807_s26 = scalar_lea.vmem %s1157_s11, 1024 }
  0x53   : > { %v349_v23 = vpack.c.bf16 %v1098_v13, %v1096_v12  ;;  %v1111_v25 = vsub.f32 %v257_v20, %v265_v22  ;;  %367 = vmatprep.subr.bf16.mxu0 %v350_v17  ;;  %v1118_v28 = vsub.f32 %v259_v21, %v267_v24  ;;  %416 = vperm.xlu1 %732, %v344_v26   ;;  %v345_v30 = vld [vmem:[%s1203_s3 + $0x10] sm:$0xff]  ;;  %v342_v31 = vld [vmem:[%s1202_s2] sm:$0x1]  ;;  %v346_v32 = vld [vmem:[%s1203_s3 + $0x18] sm:$0xff]  ;;  %p808_p13 = scmp.ne.s32.totalorder %s1157_s11, %s807_s26  ;;  %s813_s9 = scalar_lea.vmem %s812_s6, 2048 }
  0x54   : > { %v348_v27 = vpack.c.bf16 %v1105_v19, %v1103_v18  ;;  %v343_v34 = vld [vmem:[%s1203_s3] sm:$0xff]  ;;  %p814_p10 = scmp.lt.s32.totalorder %s1157_s11, %s812_s6  ;;  %p815_p0 = scmp.lt.s32.totalorder %s813_s9, %s807_s26 }
  0x55   : > { %368 = vmatpush1.bf16.msra.mxu0 %v349_v23  ;;  %v347_v29 = vpack.c.bf16 %v1118_v28, %v1111_v25  ;;  %p809_p12 = pnand %p808_p13, %p1214_p1 }
  0x56   : > { %369 = vmatprep.subr.bf16.mxu0 %v348_v27  ;;  %p816_p2 = por %p815_p0, %p814_p10 }
  0x57   : > { %421 = vperm.xlu1 %732, %v345_v30   ;;  %p810_p7 = pneg %p809_p12 }
  0x59   : > { %370 = vmatpush1.bf16.msra.mxu0 %v347_v29  ;;  %p817_p4 = pnand %p816_p2, %p810_p7 }
  0x5b   : > { %426 = vperm.xlu1 %732, %v346_v32  }
  0x5c   : > { %664 = vmatmul.mubr.msk.bf16.vlgmr.msra.gmra.mxu0 %vm351_vm0, %v342_v31 }
  0x5f   : > { %733 = vset.pattern.permute.xlu1 %v882_v33 }
  0x60   : > { %446 = vperm.xlu1 %733, %v343_v34  }
  0x64   : > { %450 = vperm.xlu1 %733, %v344_v26  }
  0x68   : > { %454 = vperm.xlu1 %733, %v345_v30  }
  0x6c   : > { %458 = vperm.xlu1 %733, %v346_v32  }
  0xce   : > { %v417_v42 = vpop.permute.xlu1 %416 }
  0xd2   : > { %v422_v43 = vpop.permute.xlu1 %421 }
  0xd6   : > { %v427_v44 = vpop.permute.xlu1 %426 }
  0xdb   : > { %v447_v45 = vpop.permute.xlu1 %446 }
  0xdf   : > { %v451_v48 = vpop.permute.xlu1 %450 }
  0xe3   : > { %v455_v56 = vpop.permute.xlu1 %454 }
  0xe7   : > { %v459_v4 = vpop.permute.xlu1 %458 }
 0x11c   : > { %v389_v35 = vpop.f32.mrf.mxu0 }
 0x11d   : > { %v399_v37 = vsel %vm398_vm1, %v389_v35, 0.0  ;;  %v396_v52 = vmax.f32 %v389_v35, 0.0 }
 0x11e   : > { %v391_v36 = vpop.f32.mrf.mxu0 }
 0x11f   : > { %v400_v38 = vsel %vm398_vm1, %v391_v36, 0.0  ;;  %v397_v53 = vmax.f32 %v391_v36, 0.0 }
 0x120   : > { %v393_v39 = vpop.f32.mrf.mxu0  ;;  %v401_v40 = vadd.f32 %v400_v38, %v399_v37 }
 0x122   : > { %402 = vadd.xlane.f32.xlu0 %v401_v40  ;;  %v394_v41 = vpop.f32.mrf.mxu0  ;;  %v284_v40 = vadd.s32 16, %v1134_v47 }
 0x138   : > { %411 = vperm.xlu0 %731, %v343_v34  }
 0x13c   : > { %734 = vset.pattern.permute.xlu0 %v882_v33  ;;  %v283_v33 = vadd.s32 8, %v1134_v47 }
 0x1ab   : > { %v403_v49 = vpop.xlane.xlu0 %402 }
 0x1ac   : > { %v405_v50 = vmul.f32 0.00390625, %v403_v49  ;;  %v883_v49 = vmov 1.0  }
 0x1ae   : > { %v406_v55 = vmax.f32 %v405_v50, 0.0 }
 0x1b0   : > { %v407_v57 = vadd.f32 %v406_v55, %v396_v52  ;;  %v408_v58 = vadd.f32 %v406_v55, %v397_v53 }
 0x1b2   : > { %v432_v59 = vrot.slane %v407_v57, %v431_v51  ;;  %v436_v60 = vrot.slane %v408_v58, %v431_v51  ;;  %v464_v61 = vrot.slane %v407_v57, %v463_v54  ;;  %v468_v62 = vrot.slane %v408_v58, %v463_v54 }
 0x1b3   : > { %v412_v3 = vpop.permute.xlu0 %411 }
 0x1b4   : > { %v439_v63 = vmul.f32 %v432_v59, %v417_v42  ;;  %v440_v0 = vmul.f32 %v436_v60, %v417_v42  ;;  %v441_v1 = vmul.f32 %v432_v59, %v422_v43  ;;  %v442_v2 = vmul.f32 %v436_v60, %v422_v43 }
 0x1b5   : > { %v443_v6 = vmul.f32 %v432_v59, %v427_v44  ;;  %v444_v7 = vmul.f32 %v436_v60, %v427_v44  ;;  %v471_v9 = vmul.f32 %v464_v61, %v451_v48  ;;  %v472_v10 = vmul.f32 %v468_v62, %v451_v48 }
 0x1b6   : > { %v473_v11 = vmul.f32 %v464_v61, %v455_v56  ;;  %v474_v14 = vmul.f32 %v468_v62, %v455_v56  ;;  %v475_v15 = vmul.f32 %v464_v61, %v459_v4  ;;  %v476_v16 = vmul.f32 %v468_v62, %v459_v4 }
 0x1b7   : > { %v479_v17 = vadd.f32 %v471_v9, %v439_v63  ;;  %v480_v20 = vadd.f32 %v472_v10, %v440_v0  ;;  %v469_v21 = vmul.f32 %v464_v61, %v447_v45  ;;  %v437_v22 = vmul.f32 %v432_v59, %v412_v3 }
 0x1b8   : > { %v481_v23 = vadd.f32 %v473_v11, %v441_v1  ;;  %v482_v24 = vadd.f32 %v474_v14, %v442_v2  ;;  %v483_v26 = vadd.f32 %v475_v15, %v443_v6  ;;  %v484_v27 = vadd.f32 %v476_v16, %v444_v7 }
 0x1b9   : > { %v495_v29 = vmul.f32 0.5, %v479_v17  ;;  %v496_v30 = vmul.f32 0.5, %v480_v20  ;;  %v438_v31 = vmul.f32 %v436_v60, %v412_v3  ;;  %v470_v32 = vmul.f32 %v468_v62, %v447_v45 }
 0x1ba   : > { %v497_v34 = vmul.f32 0.5, %v481_v23  ;;  %v498_v35 = vmul.f32 0.5, %v482_v24  ;;  %v499_v36 = vmul.f32 0.5, %v483_v26  ;;  %v477_v37 = vadd.f32 %v469_v21, %v437_v22 }
 0x1bb   : > { %735 = vtanh.f32 %v495_v29  ;;  %v478_v38 = vadd.f32 %v470_v32, %v438_v31  ;;  %v500_v39 = vmul.f32 0.5, %v484_v27  ;;  %v285_v43 = vadd.s32 24, %v1134_v47 }
 0x1bc   : > { %737 = vtanh.f32 %v496_v30  ;;  %v493_v41 = vmul.f32 0.5, %v477_v37  ;;  %v297_v44 = vand.u32 1, %v283_v33  ;;  %v304_v45 = vand.u32 1, %v284_v40 }
 0x1bd   : > { %739 = vtanh.f32 %v497_v34  ;;  %v494_v42 = vmul.f32 0.5, %v478_v38  ;;  %v311_v46 = vand.u32 1, %v285_v43  ;;  %v290_v48 = vand.u32 1, %v1134_v47 }
 0x1be   : > { %741 = vtanh.f32 %v498_v35  ;;  %vm335_vm2 = vcmp.eq.s32.totalorder %v297_v44, 0  ;;  %vm336_vm3 = vcmp.eq.s32.totalorder %v304_v45, 0 }
 0x1bf   : > { %743 = vtanh.f32 %v499_v36  ;;  %v339_v50 = vsel %vm335_vm2, -1.0, %v883_v49  ;;  %vm337_vm4 = vcmp.eq.s32.totalorder %v311_v46, 0  ;;  %v340_v52 = vsel %vm336_vm3, -1.0, %v883_v49 }
 0x1c0   : > { %745 = vtanh.f32 %v500_v39  ;;  %vm334_vm5 = vcmp.eq.s32.totalorder %v290_v48, 0  ;;  %v487_v54 = vmul.f32 %v339_v50, %v1118_v28  ;;  %v341_v57 = vsel %vm337_vm4, -1.0, %v883_v49 }
 0x1c1   : > { %747 = vtanh.f32 %v493_v41  ;;  %v488_v58 = vmul.f32 %v339_v50, %v1105_v19  ;;  %v489_v61 = vmul.f32 %v340_v52, %v1096_v12  ;;  %v490_v0 = vmul.f32 %v340_v52, %v1089_v5 }
 0x1c2   : > { %749 = vtanh.f32 %v494_v42  ;;  %v338_v1 = vsel %vm334_vm5, -1.0, %v883_v49  ;;  %v491_v28 = vmul.f32 %v341_v57, %v1098_v13  ;;  %v492_v10 = vmul.f32 %v341_v57, %v1093_v8 }
 0x1c3   : > { %v485_v5 = vmul.f32 %v338_v1, %v1111_v25  ;;  %v486_v13 = vmul.f32 %v338_v1, %v1103_v18 }
 0x1c8   : > { %v736_v51 = vpop.eup %735 }
 0x1c9   : > { %v738_v53 = vpop.eup %737  ;;  %v511_v55 = vmul.f32 0.5, %v736_v51 }
 0x1ca   : > { %v740_v56 = vpop.eup %739  ;;  %v512_v59 = vmul.f32 0.5, %v738_v53 }
 0x1cb   : > { %v742_v60 = vpop.eup %741  ;;  %v513_v62 = vmul.f32 0.5, %v740_v56  ;;  %v519_v47 = vadd.f32 1.5, %v511_v55 }
 0x1cc   : > { %v744_v63 = vpop.eup %743  ;;  %v514_v2 = vmul.f32 0.5, %v742_v60  ;;  %v520_v3 = vadd.f32 1.5, %v512_v59 }
 0x1cd   : > { %v746_v4 = vpop.eup %745  ;;  %v515_v6 = vmul.f32 0.5, %v744_v63  ;;  %v521_v7 = vadd.f32 1.5, %v513_v62  ;;  %v527_v9 = vmul.f32 %v519_v47, %v487_v54 }
 0x1ce   : > { %v748_v19 = vpop.eup %747  ;;  %v516_v12 = vmul.f32 0.5, %v746_v4  ;;  %v522_v11 = vadd.f32 1.5, %v514_v2  ;;  %v528_v14 = vmul.f32 %v520_v3, %v488_v58 }
 0x1cf   : > { %v750_v15 = vpop.eup %749  ;;  %v523_v16 = vadd.f32 1.5, %v515_v6  ;;  %v529_v17 = vmul.f32 %v521_v7, %v489_v61  ;;  %535 = vst [vmem:[%s255_s12 + $0x10] sm:$0xff] %v527_v9  ;;  %v509_v20 = vmul.f32 0.5, %v748_v19 }
 0x1d0   : > { %v524_v21 = vadd.f32 1.5, %v516_v12  ;;  %v530_v22 = vmul.f32 %v522_v11, %v490_v0  ;;  %536 = vst [vmem:[%s255_s12 + $0x18] sm:$0xff] %v528_v14  ;;  %v510_v23 = vmul.f32 0.5, %v750_v15 }
 0x1d1   : > { %v531_v8 = vmul.f32 %v523_v16, %v491_v28  ;;  %537 = vst [vmem:[%s255_s12 + $0x20] sm:$0xff] %v529_v17  ;;  %v517_v24 = vadd.f32 1.5, %v509_v20 }
 0x1d2   : > { %v532_v26 = vmul.f32 %v524_v21, %v492_v10  ;;  %538 = vst [vmem:[%s255_s12 + $0x28] sm:$0xff] %v530_v22  ;;  %v518_v25 = vadd.f32 1.5, %v510_v23 }
 0x1d3   : > { %539 = vst [vmem:[%s255_s12 + $0x30] sm:$0xff] %v531_v8  ;;  %v525_v27 = vmul.f32 %v517_v24, %v485_v5 }
 0x1d4   : > { %540 = vst [vmem:[%s255_s12 + $0x38] sm:$0xff] %v532_v26  ;;  %v526_v18 = vmul.f32 %v518_v25, %v486_v13 }
 0x1d5   : > { %533 = vst [vmem:[%s255_s12] sm:$0xff] %v525_v27 }
 0x1d6   : > { %534 = vst [vmem:[%s255_s12 + $0x8] sm:$0xff] %v526_v18 }
 0x1d7   : > { %820 = shalt.err (!%p817_p4)
}
 0x1d8   : > { %s821_s8 = scalar_lea.hbm %s1155_s20, 1024  ;;  %s825_s29 = scalar_lea.hbm %s1204_s4, 2048 }
 0x1d9   : > { %p822_p9 = scmp.ne.s32.totalorder %s1155_s20, %s821_s8  ;;  %p826_p5 = scmp.lt.s32.totalorder %s1155_s20, %s1204_s4 }
 0x1da   : > { %p827_p8 = scmp.lt.s32.totalorder %s825_s29, %s821_s8 }
 0x1db   : > { %p823_p11 = pnand %p822_p9, %p1214_p1 }
 0x1dc   : > { %p828_p6 = por %p827_p8, %p826_p5 }
 0x1dd   : > { %p824_p3 = pneg %p823_p11 }
 0x1df   : > { %p829_p13 = pnand %p828_p6, %p824_p3 }
 0x1e1   : > { %832 = shalt.err (!%p829_p13)
}
 0x1e2   : > { %s885_s12 = smov 256   ;;  %s886_s30 = smov 16  }
 0x1e3   : > { %677 = dma.vmem_to_hbm [thread:$0]  (%p1214_p1), %s1157_s11, 1024, %s1155_s20, %s542_s19, %s885_s12, %s885_s12, %s886_s30  }
 0x1e4 PF: > { %s570_s14 = sand.u32 1, %s863_s15   ;;  %p1215_p12 = scmp.ne.s32.totalorder %s1210_s28, 0 }
 0x1e5   : > { %p1216_p7 = scmp.ge.s32.totalorder %s875_s18, 2  ;;  %s571_s13 = scalar_lea.sflag [#allocation4], %s570_s14 }
 0x1e7   : > { %p687_p10 = pnand %p1216_p7, %p1215_p12 }
 0x1e9   : > { %p688_p0 = pneg %p687_p10 }
 0x1eb   : > { %858 = dma.done.wait (%p688_p0), %s571_s13, 1024  }
 0x1ec   : > { %860 = vsyncadd (%p688_p0), %s571_s13, 4294966272  ;;  %p20_p2 = scmp.ge.s32.totalorder %s937_s21, 4   ;;  %s1217_s15 = smov %s867_s16 }
 0x1ed   : > { %s1218_s16 = smov %s871_s17  ;;  %s1219_s17 = smov %s949_s24 }
 0x1ee   : > { %s1220_s18 = smov %s937_s21  ;;  %22 = sbr.rel (!%p20_p2) target bundleno = 7 (0x7), region = 94 }
 0x1f3   :  { %576 = vsyncpa [#allocation3], 1 }
 0x1f4   :  { %578 = vsyncpa [#allocation3 + $0x1], 1 }
 0x1f5   :  { %579 = vsyncpa [#allocation6], 1 }
 0x1f6   :  { %581 = vsyncpa [#allocation6 + $0x1], 1 }
 0x1f7   :  { %582 = vsyncpa [#allocation4], 1 }
 0x1f8   :  { %584 = vsyncpa [#allocation4 + $0x1], 1 }

</bundles_post_ra>
